<compile_context>
chip_gen: v7x
topology: tpu7x:2x2x1
jax: 0.10.0
libtpu: 0.0.40
codegen_flags: <defaults>
</compile_context>

<pallas_src>
import math

import jax
import jax.numpy as jnp
from jax.experimental import pallas as pl
from jax.experimental.pallas import tpu as pltpu


def _affine_kernel_with_beta(params_ref, x_ref, o_ref):
    # params_ref: (2, tl) f32  (row 0 = alpha, row 1 = beta); x_ref/o_ref: (tr, tl)
    x = x_ref[...].astype(jnp.float32)
    alpha = params_ref[0:1, :]
    beta = params_ref[1:2, :]
    o_ref[...] = (alpha * x + beta).astype(o_ref.dtype)


def _affine_kernel_no_beta(params_ref, x_ref, o_ref):
    # params_ref: (1, tl) f32; x_ref/o_ref: (tr, tl)
    x = x_ref[...].astype(jnp.float32)
    o_ref[...] = (params_ref[...] * x).astype(o_ref.dtype)


def _sublane_packing(itemsize: int) -> int:
    if itemsize >= 4:
        return 8
    if itemsize == 2:
        return 16
    return 32


def _vmem_capacity_bytes() -> int:
    """Physical VMEM per core; conservative 64 MiB fallback (safe on v5e/v6e/v7x)."""
    try:
        info = pltpu.get_tpu_info()
        for attr in ("vmem_capacity_bytes", "vmem_size_bytes", "vmem_bytes"):
            v = getattr(info, attr, None)
            if v:
                return int(v)
    except Exception:
        pass
    return 64 << 20


def _round_up(a: int, m: int) -> int:
    return ((a + m - 1) // m) * m


def affine_transform(x, alpha, beta=None, *, target_block_bytes=None, donate_x=False):
    """y = alpha * x + beta (broadcast over leading dims), as a Pallas TPU kernel.

    x:     (..., dim)   floating dtype
    alpha: (dim,)
    beta:  (dim,) or None
    donate_x: alias x's HBM buffer to the output (only set when the caller donates x).
    """
    if not jnp.issubdtype(x.dtype, jnp.floating):
        # PyTorch's Aff layer is float-only; integer affine would need explicit rounding.
        raise NotImplementedError("affine_transform only supports floating dtypes")

    orig_shape = x.shape
    dim = orig_shape[-1]
    n_rows_total = int(math.prod(orig_shape[:-1])) if len(orig_shape) > 1 else 1
    x2 = x.reshape(n_rows_total, dim)

    alpha_f = alpha.reshape(dim).astype(jnp.float32)
    beta_f = beta.reshape(dim).astype(jnp.float32) if beta is not None else None

    # ---- Lane-dense folding (free contiguous reshape) ------------------------------
    k = 1
    if dim % 128 != 0:
        k_cand = 128 // math.gcd(dim, 128)
        if k_cand > 1 and n_rows_total % k_cand == 0:
            k = k_cand
    if k > 1:
        x2 = x2.reshape(n_rows_total // k, k * dim)
        alpha_f = jnp.tile(alpha_f, (k,))
        if beta_f is not None:
            beta_f = jnp.tile(beta_f, (k,))

    rows, lane = x2.shape
    itemsize = jnp.dtype(x.dtype).itemsize
    sub = _sublane_packing(itemsize)

    # ---- Generation-aware tile / VMEM sizing ----------------------------------------
    vmem_cap = _vmem_capacity_bytes()
    vmem_ceiling = max(48 << 20, (vmem_cap * 3) // 4)  # ~96 MiB v5e/v6e, 48 MiB v7x
    if target_block_bytes is None:
        target_block_bytes = (16 << 20) if vmem_cap >= (100 << 20) else (8 << 20)
    target_block_bytes = int(max(target_block_bytes, 1024))

    # Lane (feature) tiling: split very wide feature dims into 128-multiple chunks so a
    # single sublane-group of rows still fits the per-tile budget.
    if sub * lane * itemsize > target_block_bytes and lane >= 256:
        tl = (target_block_bytes // (sub * itemsize)) // 128 * 128
        tl = int(min(max(tl, 128), (lane // 128) * 128))
    else:
        tl = lane

    # Row tiling: biggest sublane-aligned row tile within the budget.
    row_tile_bytes = max(tl * itemsize, 1)
    tr = max(sub, (target_block_bytes // row_tile_bytes) // sub * sub)
    if tr >= rows:
        tr = rows  # full extent is always a legal block shape
    nr = pl.cdiv(rows, tr)
    nl = pl.cdiv(lane, tl)

    # Guarantee >=2 grid steps whenever rows allow, so the "parallel" axes can shard the
    # stream across both v7x TensorCores (negligible per-step cost on v5e/v6e).
    if nr * nl < 2 and rows > sub:
        tr = _round_up(pl.cdiv(rows, 2), sub)
        nr = pl.cdiv(rows, tr)

    if beta_f is not None:
        params = jnp.stack([alpha_f, beta_f], axis=0)  # (2, lane) f32
        kernel = _affine_kernel_with_beta
    else:
        params = alpha_f.reshape(1, lane)              # (1, lane) f32
        kernel = _affine_kernel_no_beta

    param_spec = pl.BlockSpec((params.shape[0], tl), lambda i, j: (0, j))  # resident over rows
    x_spec = pl.BlockSpec((tr, tl), lambda i, j: (i, j))

    # VMEM budget: 2 buffers x (input tile + output tile) + params buffers + headroom.
    tile_bytes = tr * tl * itemsize
    params_bytes = int(params.size) * 4
    vmem_limit = 4 * tile_bytes + 4 * params_bytes + (4 << 20)
    vmem_limit = int(min(max(vmem_limit, 32 << 20), vmem_ceiling))

    out2 = pl.pallas_call(
        kernel,
        out_shape=jax.ShapeDtypeStruct((rows, lane), x.dtype),
        grid_spec=pltpu.PrefetchScalarGridSpec(
            num_scalar_prefetch=0,
            grid=(nr, nl),
            in_specs=[param_spec, x_spec],
            out_specs=x_spec,
        ),
        compiler_params=pltpu.CompilerParams(
            dimension_semantics=("parallel", "parallel"),
            vmem_limit_bytes=vmem_limit,
        ),
        input_output_aliases=({1: 0} if donate_x else {}),
    )(params, x2)

    return out2.reshape(orig_shape)


class AffineTransform:
    """JAX/Pallas port of the PyTorch AffineTransform module (ResMLP Aff layer)."""

    def __init__(self, dim: int, alpha: float = 1.0, beta=0.0, dtype=jnp.float32):
        # Deterministic init exactly like the PyTorch module: alpha*ones(dim), beta*ones(dim).
        self.aff_alpha = alpha * jnp.ones((dim,), dtype=dtype)
        self.aff_beta = beta * jnp.ones((dim,), dtype=dtype) if beta is not None else None

    def __call__(self, x):
        return affine_transform(x, self.aff_alpha, self.aff_beta)


if __name__ == "__main__":
    key = jax.random.PRNGKey(0)

    # 1) ResMLP-style (batch, seq, dim) input with small dim (exercises lane-dense row
    #    folding: 16 rows x dim=32 -> 4 rows x 128 lanes).
    batch, seq, dim = 2, 8, 32
    x = jax.random.normal(key, (batch, seq, dim), dtype=jnp.float32)
    module = AffineTransform(dim, alpha=0.5, beta=0.25)
    y = jax.block_until_ready(module(x))
    y_ref = module.aff_alpha * x + module.aff_beta
    assert y.shape == x.shape
    assert jnp.allclose(y, y_ref, atol=1e-6, rtol=1e-6)

    # 2) Post-normalization Aff: beta=None branch.
    module_nb = AffineTransform(dim, alpha=1e-4, beta=None)
    y_nb = jax.block_until_ready(module_nb(x))
    assert jnp.allclose(y_nb, module_nb.aff_alpha * x, atol=1e-6, rtol=1e-6)

    # 3) Ragged-grid / masked fallback: rows not divisible by the row tile and dim not
    #    foldable (no host-side padding; partial last block is masked).
    x_r = jax.random.normal(jax.random.PRNGKey(1), (3, 7, 48), dtype=jnp.float32)
    alpha_r = jnp.linspace(0.5, 1.5, 48, dtype=jnp.float32)
    beta_r = jnp.linspace(-0.25, 0.25, 48, dtype=jnp.float32)
    y_r = jax.block_until_ready(
        affine_transform(x_r, alpha_r, beta_r, target_block_bytes=2048)
    )
    assert jnp.allclose(y_r, alpha_r * x_r + beta_r, atol=1e-6, rtol=1e-6)

    # 4) Wide feature dim with a tiny tile budget -> exercises the 2-D grid (lane chunks
    #    of 128 multiples) and per-chunk alpha/beta indexing.
    x_w = jax.random.normal(jax.random.PRNGKey(2), (4, 16, 512), dtype=jnp.float32)
    alpha_w = jnp.linspace(0.5, 1.5, 512, dtype=jnp.float32)
    beta_w = jnp.linspace(-1.0, 1.0, 512, dtype=jnp.float32)
    y_w = jax.block_until_ready(
        affine_transform(x_w, alpha_w, beta_w, target_block_bytes=8192)
    )
    assert jnp.allclose(y_w, alpha_w * x_w + beta_w, atol=1e-5, rtol=1e-5)

    # 5) Mid-size tensor that fits a single tile -> forced split into >=2 row blocks
    #    (so both v7x TensorCores get work).
    x_m = jax.random.normal(jax.random.PRNGKey(3), (1, 64, 128), dtype=jnp.float32)
    alpha_m = jnp.linspace(0.9, 1.1, 128, dtype=jnp.float32)
    beta_m = jnp.linspace(-0.1, 0.1, 128, dtype=jnp.float32)
    y_m = jax.block_until_ready(affine_transform(x_m, alpha_m, beta_m))
    assert jnp.allclose(y_m, alpha_m * x_m + beta_m, atol=1e-6, rtol=1e-6)

    # 6) bf16 input (sublane packing 16); reference computed the same way (f32 math,
    #    cast back to bf16).
    x_b = jax.random.normal(jax.random.PRNGKey(4), (2, 8, 256), dtype=jnp.bfloat16)
    alpha_b = jnp.linspace(0.5, 1.5, 256, dtype=jnp.float32)
    beta_b = jnp.linspace(-0.5, 0.5, 256, dtype=jnp.float32)
    y_b = jax.block_until_ready(affine_transform(x_b, alpha_b, beta_b))
    y_b_ref = (alpha_b * x_b.astype(jnp.float32) + beta_b).astype(jnp.bfloat16)
    assert jnp.allclose(y_b.astype(jnp.float32), y_b_ref.astype(jnp.float32),
                        atol=1e-2, rtol=1e-2)

    print("KERNEL_OK")
</pallas_src>

<mosaic_0001>
module attributes {stable_mosaic.version = 11 : i64} {
  func.func @_affine_kernel_with_beta(%arg0: i32, %arg1: i32, %arg2: memref<2x128xf32, #tpu.memory_space<vmem>>, %arg3: memref<4x128xf32, #tpu.memory_space<vmem>>, %arg4: memref<4x128xf32, #tpu.memory_space<vmem>>) attributes {dimension_semantics = [#tpu.dimension_semantics<parallel>, #tpu.dimension_semantics<parallel>], iteration_bounds = array<i64: 1, 1>, scalar_prefetch = 0 : i64, scratch_operands = 0 : i64, tpu.core_type = #tpu.core_type<tc>, window_params = [{transform_indices = @transform_0, window_bounds = array<i64: 2, 128>}, {transform_indices = @transform_1, window_bounds = array<i64: 4, 128>}, {transform_indices = @transform_2, window_bounds = array<i64: 4, 128>}]} {
    %c0 = arith.constant 0 : index
    %c0_0 = arith.constant 0 : index
    %0 = vector.load %arg3[%c0, %c0_0] : memref<4x128xf32, #tpu.memory_space<vmem>>, vector<4x128xf32>
    %c0_1 = arith.constant 0 : index
    %c0_2 = arith.constant 0 : index
    %1 = vector.load %arg2[%c0_1, %c0_2] : memref<2x128xf32, #tpu.memory_space<vmem>>, vector<1x128xf32>
    %c1 = arith.constant 1 : index
    %c0_3 = arith.constant 0 : index
    %2 = vector.load %arg2[%c1, %c0_3] : memref<2x128xf32, #tpu.memory_space<vmem>>, vector<1x128xf32>
    %3 = vector.broadcast %1 : vector<1x128xf32> to vector<4x128xf32>
    %4 = arith.mulf %3, %0 : vector<4x128xf32>
    %5 = vector.broadcast %2 : vector<1x128xf32> to vector<4x128xf32>
    %6 = arith.addf %4, %5 : vector<4x128xf32>
    %c0_4 = arith.constant 0 : index
    %c0_5 = arith.constant 0 : index
    %7 = vector.load %arg4[%c0_4, %c0_5] : memref<4x128xf32, #tpu.memory_space<vmem>>, vector<4x128xf32>
    tpu.vector_store %arg4[%c0_4, %c0_5], %6 {strides = array<i32>} : memref<4x128xf32, #tpu.memory_space<vmem>>, vector<4x128xf32>,
    return
  }
  func.func @transform_0(%arg0: i32, %arg1: i32) -> (i32, i32) {
    %c0_i32 = arith.constant 0 : i32
    %c0_i32_0 = arith.constant 0 : i32
    return %c0_i32, %arg1 : i32, i32
  }
  func.func @transform_1(%arg0: i32, %arg1: i32) -> (i32, i32) {
    %c0_i32 = arith.constant 0 : i32
    return %arg0, %arg1 : i32, i32
  }
  func.func @transform_2(%arg0: i32, %arg1: i32) -> (i32, i32) {
    %c0_i32 = arith.constant 0 : i32
    return %arg0, %arg1 : i32, i32
  }
}

</mosaic_0001>

<bundles_post_ra>
// kernel: tpu_custom_call.1
= control target key start
LH: loop header
LB: loop body
LE: loop exit
PB: predicated region body
PF: predicated region fallthrough
CT: control target
= control target key end

     0   :  { %7 = vsyncpa [#allocation3], 0  ;;  %s197_s0 = inlined_call_operand.hbm [shape: f32[2,128], index: 0, kind: input, shape index: {}]   ;;  %s198_s1 = inlined_call_operand.hbm [shape: f32[4,128], index: 1, kind: input, shape index: {}]   ;;  %s199_s2 = inlined_call_operand.hbm [shape: f32[4,128], index: 2, kind: output, shape index: {}]  }
   0x1   :  { %8 = vsyncpa [#allocation6], 0 }
   0x2   :  { %9 = vsyncpa [#allocation4], 0  ;;  %s143_s9 = smov [#allocation2]   ;;  %s144_s11 = smov [#allocation5]  }
   0x3   :  { %s16_s10 = sshll.u32 %s143_s9, 4  ;;  %s26_s12 = sshll.u32 %s144_s11, 4  ;;  %s17_s10 = int_to_ptr.vmem [resolvable:$true] %s16_s10  ;;  %s27_s12 = int_to_ptr.vmem [resolvable:$true] %s26_s12 }
   0x4   :  { %s71_s15 = scalar_lea.hbm %s197_s0, 32 }
   0x5   :  { %p72_p0 = scmp.ne.s32.totalorder %s197_s0, %s71_s15  ;;  %p75_p1 = scmp.lt.u32.totalorder %s71_s15, %s197_s0 }
   0x7   :  { %p77_p2 = pnand %p75_p1, %p72_p0 }
   0x9   :  { %80 = shalt.err (!%p77_p2)
}
   0xa   :  { %s81_s20 = scalar_lea.vmem %s17_s10, 32  ;;  %p86_p4 = scmp.lt.s32.totalorder %s17_s10, %s17_s10 }
   0xb   :  { %p82_p3 = scmp.ne.s32.totalorder %s17_s10, %s81_s20  ;;  %p87_p5 = scmp.lt.s32.totalorder %s81_s20, %s81_s20 }
   0xd   :  { %p88_p6 = por %p87_p5, %p86_p4 }
   0xf   :  { %p89_p7 = pnand %p88_p6, %p82_p3 }
  0x11   :  { %92 = shalt.err (!%p89_p7)
}
  0x12   :  { %19 = dma.hbm_to_vmem [thread:$0]  %s197_s0, 32, %s17_s10, [#allocation3]  }
  0x13   :  { %s93_s25 = scalar_lea.hbm %s198_s1, 64 }
  0x14   :  { %p94_p8 = scmp.ne.s32.totalorder %s198_s1, %s93_s25  ;;  %p97_p9 = scmp.lt.u32.totalorder %s93_s25, %s198_s1 }
  0x16   :  { %p99_p10 = pnand %p97_p9, %p94_p8 }
  0x18   :  { %102 = shalt.err (!%p99_p10)
}
  0x19   :  { %s103_s30 = scalar_lea.vmem %s27_s12, 64  ;;  %p108_p12 = scmp.lt.s32.totalorder %s27_s12, %s27_s12 }
  0x1a   :  { %p104_p11 = scmp.ne.s32.totalorder %s27_s12, %s103_s30  ;;  %p109_p13 = scmp.lt.s32.totalorder %s103_s30, %s103_s30 }
  0x1c   :  { %p110_p0 = por %p109_p13, %p108_p12 }
  0x1e   :  { %p111_p1 = pnand %p110_p0, %p104_p11 }
  0x20   :  { %114 = shalt.err (!%p111_p1)
}
  0x21   :  { %29 = dma.hbm_to_vmem [thread:$0]  %s198_s1, 64, %s27_s12, [#allocation6]  }
  0x22   :  { %137 = dma.done.wait [#allocation3], 32  }
  0x23   :  { %138 = vsyncadd [#allocation3], 4294967264 }
  0x24   :  { %139 = dma.done.wait [#allocation6], 64  }
  0x25   :  { %140 = vsyncadd [#allocation6], 4294967232  ;;  %s145_s4 = smov [#allocation7]   ;;  %v36_v0 = vld [vmem:[#allocation5] sm:$0xf] }
  0x26   :  { %s56_s5 = sshll.u32 %s145_s4, 4  ;;  %v66_v1 = vld [vmem:[#allocation2] ss:$0 sm:$0xff]  ;;  %v67_v2 = vld [vmem:[#allocation2 + $0x1] ss:$0 sm:$0xff]  ;;  %s57_s5 = int_to_ptr.vmem [resolvable:$true] %s56_s5 }
  0x27   :  { %v43_v3 = vmul.f32 %v66_v1, %v36_v0  ;;  %s115_s6 = scalar_lea.vmem %s57_s5, 64  ;;  %p120_p3 = scmp.lt.s32.totalorder %s57_s5, %s57_s5 }
  0x28   :  { %p116_p2 = scmp.ne.s32.totalorder %s57_s5, %s115_s6  ;;  %p121_p4 = scmp.lt.s32.totalorder %s115_s6, %s115_s6 }
  0x29   :  { %v48_v4 = vadd.f32 %v67_v2, %v43_v3 }
  0x2a   :  { %p122_p5 = por %p121_p4, %p120_p3 }
  0x2b   :  { %49 = vst [vmem:[#allocation7] sm:$0xf] %v48_v4 }
  0x2c   :  { %p123_p6 = pnand %p122_p5, %p116_p2 }
  0x2e   :  { %126 = shalt.err (!%p123_p6)
}
  0x2f   :  { %s127_s8 = scalar_lea.hbm %s199_s2, 64 }
  0x30   :  { %p128_p7 = scmp.ne.s32.totalorder %s199_s2, %s127_s8  ;;  %p131_p8 = scmp.lt.u32.totalorder %s127_s8, %s199_s2 }
  0x32   :  { %p133_p9 = pnand %p131_p8, %p128_p7 }
  0x34   :  { %136 = shalt.err (!%p133_p9)
}
  0x35   :  { %59 = dma.vmem_to_hbm [thread:$0]  %s57_s5, 64, %s199_s2, [#allocation4]  }
  0x36   :  { %141 = dma.done.wait [#allocation4], 64  }
  0x37   :  { %142 = vsyncadd [#allocation4], 4294967232 }
  0x38   :  { %63 = vsyncpa [#allocation3], 1 }
  0x39   :  { %64 = vsyncpa [#allocation6], 1 }
  0x3a   :  { %65 = vsyncpa [#allocation4], 1 }

</bundles_post_ra>
